<compile_context>
chip_gen: v6e
topology: v6e:2x2x1
jax: 0.10.0
libtpu: 0.0.40
codegen_flags: <defaults>
</compile_context>

<pallas_src>
import functools

import jax
import jax.numpy as jnp
from jax import lax
from jax.experimental import pallas as pl
from jax.experimental.pallas import tpu as pltpu

_LANES = 128  # TPU vreg lane width


def _simplenet_kernel(xT_ref, w1T_ref, b1_ref, w2_ref, b2_ref, o_ref, *,
                      strip, unroll, compute_dtype):
    """One batch tile, transposed layout (batch on lanes), strip-fused.

    xT_ref : (D, TB)  input features, batch on the lane axis
    w1T_ref: (H, D)   layer1 weight, transposed to (out, in)
    b1_ref : (H, 1)   layer1 bias as a column
    w2_ref : (H, O)   layer2 weight (in, out)
    b2_ref : (1, O)   layer2 bias as a row
    o_ref  : (O, TB)  sigmoid outputs, batch on lanes (lane-dense store)
    """
    H, D = w1T_ref.shape
    O = w2_ref.shape[1]
    TB = o_ref.shape[1]
    n_strips = TB // strip

    # Load params once per grid step; hoist every (column -> strip) lane
    # broadcast out of the strip loop (JAX does not CSE broadcast_in_dim).
    w1T = w1T_ref[...].astype(compute_dtype)              # (H, D)
    w2 = w2_ref[...].astype(compute_dtype)                # (H, O)
    b1 = b1_ref[...].astype(compute_dtype)                # (H, 1)
    b2 = b2_ref[...]                                       # (1, O) f32

    w1_cols = [jnp.broadcast_to(w1T[:, d:d + 1], (H, strip)) for d in range(D)]
    w2_cols = [jnp.broadcast_to(w2[:, o:o + 1], (H, strip)) for o in range(O)]
    b1_b = jnp.broadcast_to(b1, (H, strip))

    def strip_body(s, carry):
        if isinstance(s, int):
            start = s * strip
        else:
            start = pl.multiple_of(s * strip, strip)
        xs = xT_ref[:, pl.ds(start, strip)].astype(compute_dtype)   # (D, strip)

        # --- layer1: Linear + (Dropout == identity in eval) + ReLU --------
        # hT[h, b] = sum_d W1[d, h] * x[b, d]; K = D is tiny, so unrolled VPU
        # broadcast multiply-adds (MXU bypassed on purpose).
        hT = w1_cols[0] * xs[0:1, :]
        for d in range(1, D):
            hT = hT + w1_cols[d] * xs[d:d + 1, :]
        hT = jnp.maximum(hT + b1_b, 0)                               # (H, strip)

        # --- layer2: Linear + Sigmoid -------------------------------------
        # N = O is tiny: VPU multiply (compute dtype) + f32 XLU cross-sublane
        # reduce + EUP sigmoid, then a lane-dense store.
        for o in range(O):
            prod = (hT * w2_cols[o]).astype(jnp.float32)
            y = jnp.sum(prod, axis=0, keepdims=True) + b2[:, o:o + 1]  # (1, strip)
            o_ref[o:o + 1, pl.ds(start, strip)] = jax.nn.sigmoid(y)
        return carry

    if n_strips == 1:
        strip_body(0, 0)
    else:
        lax.fori_loop(0, n_strips, strip_body, 0, unroll=unroll)


def _auto_compute_dtype():
    """bf16 elementwise math on v6e / v7x (bf16 VALUs); f32 elsewhere (v5e
    and older have no bf16 VALU/EUP, so casts would cost on the binding unit)."""
    try:
        kind = jax.devices()[0].device_kind.lower()
    except Exception:
        return jnp.float32
    if ("v6" in kind) or ("v7" in kind) or ("7x" in kind):
        return jnp.bfloat16
    return jnp.float32


def simplenet_forward(x, w1, b1, w2, b2, *, block_b=32768, compute_dtype=None):
    """x: (B, input_dim); w1: (input_dim, hidden); b1: (hidden,);
       w2: (hidden, output_dim); b2: (output_dim,).
       Returns sigmoid activations with size-1 dims squeezed (torch .squeeze())."""
    B, D = x.shape
    H = w1.shape[1]
    O = w2.shape[1]
    if compute_dtype is None:
        compute_dtype = _auto_compute_dtype()

    # --- batch tile selection ---------------------------------------------
    # Large tiles amortize per-grid-step overhead (~600 cycles); keep >= 2
    # grid steps when the batch allows so the "parallel" axis can be sharded
    # across v7x's two TensorCores.  Balance the tiles to minimize padding.
    b_pad = pl.cdiv(B, _LANES) * _LANES
    n_steps = max(pl.cdiv(b_pad, block_b), 2 if b_pad > _LANES else 1)
    tb = pl.cdiv(pl.cdiv(b_pad, n_steps), _LANES) * _LANES
    b_pad = n_steps * tb
    grid = (n_steps,)

    # Lane-strip width inside the kernel: each strip's hidden activation
    # (H, strip) is produced and consumed entirely in vregs.
    if tb % 512 == 0:
        strip = 512
    elif tb % 256 == 0:
        strip = 256
    else:
        strip = _LANES
    unroll = min(4, tb // strip)

    # Single fused pass over x: transpose + cast + pad (no zeros+set copy).
    xT = jnp.pad(x.astype(compute_dtype).T, ((0, 0), (0, b_pad - B)))
    w1T = w1.T.astype(jnp.float32)                 # (H, D)
    b1c = b1.reshape(H, 1).astype(jnp.float32)     # (H, 1)
    w2f = w2.astype(jnp.float32)                   # (H, O)
    b2r = b2.reshape(1, O).astype(jnp.float32)     # (1, O)

    kernel = functools.partial(_simplenet_kernel, strip=strip, unroll=unroll,
                               compute_dtype=compute_dtype)

    outT = pl.pallas_call(
        kernel,
        out_shape=jax.ShapeDtypeStruct((O, b_pad), jnp.float32),
        grid_spec=pltpu.PrefetchScalarGridSpec(
            num_scalar_prefetch=0,
            grid=grid,
            in_specs=[
                pl.BlockSpec((D, tb), lambda i: (0, i)),   # x tile (streamed)
                pl.BlockSpec((H, D), lambda i: (0, 0)),    # W1^T (resident)
                pl.BlockSpec((H, 1), lambda i: (0, 0)),    # b1   (resident)
                pl.BlockSpec((H, O), lambda i: (0, 0)),    # W2   (resident)
                pl.BlockSpec((1, O), lambda i: (0, 0)),    # b2   (resident)
            ],
            out_specs=pl.BlockSpec((O, tb), lambda i: (0, i)),
        ),
        compiler_params=pltpu.CompilerParams(
            dimension_semantics=("parallel",),  # shard batch tiles over v7x's 2 TCs
        ),
    )(xT, w1T, b1c, w2f, b2r)

    # Drop the batch padding without an extra transpose pass.
    if O == 1:
        return jnp.squeeze(outT[0, :B])          # matches torch .squeeze()
    return jnp.squeeze(outT[:, :B].T)


if __name__ == "__main__":
    # Small shapes consistent with the Moon data MLP:
    #   input_dim=2 (moon features), hidden_dim=32, output_dim=1, batch=8.
    B, INPUT_DIM, HIDDEN_DIM, OUTPUT_DIM = 8, 2, 32, 1

    key = jax.random.PRNGKey(0)
    kx, kw1, kb1, kw2, kb2 = jax.random.split(key, 5)

    x = jax.random.normal(kx, (B, INPUT_DIM), dtype=jnp.float32)

    # Deterministic synthetic parameters (same shapes as nn.Linear weights,
    # stored already transposed to (in, out) for the x @ W layout).
    w1 = jax.random.normal(kw1, (INPUT_DIM, HIDDEN_DIM), dtype=jnp.float32) * 0.5
    b1 = jax.random.normal(kb1, (HIDDEN_DIM,), dtype=jnp.float32) * 0.1
    w2 = jax.random.normal(kw2, (HIDDEN_DIM, OUTPUT_DIM), dtype=jnp.float32) * 0.5
    b2 = jax.random.normal(kb2, (OUTPUT_DIM,), dtype=jnp.float32) * 0.1

    # Reference in plain JAX (same eval-mode semantics: dropout == identity).
    ref = jax.nn.sigmoid(jnp.maximum(x @ w1 + b1, 0.0) @ w2 + b2).squeeze()

    # 1) Forced f32 path: tight tolerance.
    out_f32 = jax.block_until_ready(
        simplenet_forward(x, w1, b1, w2, b2, compute_dtype=jnp.float32))
    assert out_f32.shape == (B,), f"unexpected output shape {out_f32.shape}"
    assert jnp.allclose(out_f32, ref, atol=1e-5, rtol=1e-5), "f32 mismatch vs reference"

    # 2) Auto path (bf16 elementwise on v6e/v7x, f32 on v5e): looser tolerance
    #    only when bf16 math was actually selected.
    auto_dtype = _auto_compute_dtype()
    out_auto = jax.block_until_ready(simplenet_forward(x, w1, b1, w2, b2))
    tol = 2e-2 if auto_dtype == jnp.bfloat16 else 1e-5
    assert out_auto.shape == (B,), f"unexpected output shape {out_auto.shape}"
    assert jnp.allclose(out_auto, ref, atol=tol, rtol=tol), "auto-dtype mismatch vs reference"

    print("KERNEL_OK")
</pallas_src>

<mosaic_0001>
module attributes {stable_mosaic.version = 11 : i64} {
  func.func @_simplenet_kernel(%arg0: i32, %arg1: memref<2x128xf32, #tpu.memory_space<vmem>>, %arg2: memref<32x2xf32, #tpu.memory_space<vmem>>, %arg3: memref<32x1xf32, #tpu.memory_space<vmem>>, %arg4: memref<32x1xf32, #tpu.memory_space<vmem>>, %arg5: memref<1x1xf32, #tpu.memory_space<vmem>>, %arg6: memref<1x128xf32, #tpu.memory_space<vmem>>) attributes {dimension_semantics = [#tpu.dimension_semantics<parallel>], iteration_bounds = array<i64: 1>, scalar_prefetch = 0 : i64, scratch_operands = 0 : i64, tpu.core_type = #tpu.core_type<tc>, window_params = [{transform_indices = @transform_0, window_bounds = array<i64: 2, 128>}, {pipeline_mode = #tpu.pipeline_mode<synchronous>, transform_indices = @transform_1, window_bounds = array<i64: 32, 2>}, {pipeline_mode = #tpu.pipeline_mode<synchronous>, transform_indices = @transform_2, window_bounds = array<i64: 32, 1>}, {pipeline_mode = #tpu.pipeline_mode<synchronous>, transform_indices = @transform_3, window_bounds = array<i64: 32, 1>}, {pipeline_mode = #tpu.pipeline_mode<synchronous>, transform_indices = @transform_4, window_bounds = array<i64: 1, 1>}, {transform_indices = @transform_5, window_bounds = array<i64: 1, 128>}]} {
    %c0 = arith.constant 0 : index
    %c0_0 = arith.constant 0 : index
    %0 = vector.load %arg2[%c0, %c0_0] : memref<32x2xf32, #tpu.memory_space<vmem>>, vector<32x2xf32>
    %c0_1 = arith.constant 0 : index
    %c0_2 = arith.constant 0 : index
    %1 = vector.load %arg4[%c0_1, %c0_2] : memref<32x1xf32, #tpu.memory_space<vmem>>, vector<32x1xf32>
    %c0_3 = arith.constant 0 : index
    %c0_4 = arith.constant 0 : index
    %2 = vector.load %arg3[%c0_3, %c0_4] : memref<32x1xf32, #tpu.memory_space<vmem>>, vector<32x1xf32>
    %c0_5 = arith.constant 0 : index
    %c0_6 = arith.constant 0 : index
    %3 = vector.load %arg5[%c0_5, %c0_6] : memref<1x1xf32, #tpu.memory_space<vmem>>, vector<1x1xf32>
    %4 = vector.extract_strided_slice %0 {offsets = [0, 0], sizes = [32, 1], strides = [1, 1]} : vector<32x2xf32> to vector<32x1xf32>
    %5 = vector.shape_cast %4 : vector<32x1xf32> to vector<32x1xf32>
    %6 = vector.broadcast %5 : vector<32x1xf32> to vector<32x128xf32>
    %7 = vector.extract_strided_slice %0 {offsets = [0, 1], sizes = [32, 1], strides = [1, 1]} : vector<32x2xf32> to vector<32x1xf32>
    %8 = vector.shape_cast %7 : vector<32x1xf32> to vector<32x1xf32>
    %9 = vector.broadcast %8 : vector<32x1xf32> to vector<32x128xf32>
    %10 = vector.shape_cast %1 : vector<32x1xf32> to vector<32x1xf32>
    %11 = vector.broadcast %10 : vector<32x1xf32> to vector<32x128xf32>
    %12 = vector.shape_cast %2 : vector<32x1xf32> to vector<32x1xf32>
    %13 = vector.broadcast %12 : vector<32x1xf32> to vector<32x128xf32>
    %c0_7 = arith.constant 0 : index
    %c0_8 = arith.constant 0 : index
    %14 = vector.load %arg1[%c0_7, %c0_8] : memref<2x128xf32, #tpu.memory_space<vmem>>, vector<2x128xf32>
    %15 = vector.extract_strided_slice %14 {offsets = [0, 0], sizes = [1, 128], strides = [1, 1]} : vector<2x128xf32> to vector<1x128xf32>
    %16 = vector.broadcast %15 : vector<1x128xf32> to vector<32x128xf32>
    %17 = arith.mulf %6, %16 : vector<32x128xf32>
    %18 = vector.extract_strided_slice %14 {offsets = [1, 0], sizes = [1, 128], strides = [1, 1]} : vector<2x128xf32> to vector<1x128xf32>
    %19 = vector.broadcast %18 : vector<1x128xf32> to vector<32x128xf32>
    %20 = arith.mulf %9, %19 : vector<32x128xf32>
    %21 = arith.addf %17, %20 : vector<32x128xf32>
    %22 = arith.addf %21, %13 : vector<32x128xf32>
    %cst = arith.constant 0.000000e+00 : f32
    %23 = vector.broadcast %cst : f32 to vector<32x128xf32>
    %24 = arith.maximumf %22, %23 : vector<32x128xf32>
    %25 = arith.mulf %24, %11 : vector<32x128xf32>
    %cst_9 = arith.constant dense<0.000000e+00> : vector<128xf32>
    %26 = vector.multi_reduction <add>, %25, %cst_9 [0] : vector<32x128xf32> to vector<128xf32>
    %27 = vector.shape_cast %26 : vector<128xf32> to vector<1x128xf32>
    %28 = vector.broadcast %3 : vector<1x1xf32> to vector<1x128xf32>
    %29 = arith.addf %27, %28 : vector<1x128xf32>
    %30 = arith.negf %29 : vector<1x128xf32>
    %31 = math.exp %30 : vector<1x128xf32>
    %cst_10 = arith.constant 1.000000e+00 : f32
    %32 = vector.broadcast %cst_10 : f32 to vector<1x128xf32>
    %33 = arith.addf %32, %31 : vector<1x128xf32>
    %34 = arith.divf %32, %33 : vector<1x128xf32>
    %c0_11 = arith.constant 0 : index
    %c0_12 = arith.constant 0 : index
    %35 = vector.load %arg6[%c0_11, %c0_12] : memref<1x128xf32, #tpu.memory_space<vmem>>, vector<1x128xf32>
    tpu.vector_store %arg6[%c0_11, %c0_12], %34 {strides = array<i32>} : memref<1x128xf32, #tpu.memory_space<vmem>>, vector<1x128xf32>,
    return
  }
  func.func @transform_0(%arg0: i32) -> (i32, i32) {
    %c0_i32 = arith.constant 0 : i32
    %c0_i32_0 = arith.constant 0 : i32
    return %c0_i32, %arg0 : i32, i32
  }
  func.func @transform_1(%arg0: i32) -> (i32, i32) {
    %c0_i32 = arith.constant 0 : i32
    %c0_i32_0 = arith.constant 0 : i32
    %c0_i32_1 = arith.constant 0 : i32
    return %c0_i32, %c0_i32_0 : i32, i32
  }
  func.func @transform_2(%arg0: i32) -> (i32, i32) {
    %c0_i32 = arith.constant 0 : i32
    %c0_i32_0 = arith.constant 0 : i32
    %c0_i32_1 = arith.constant 0 : i32
    return %c0_i32, %c0_i32_0 : i32, i32
  }
  func.func @transform_3(%arg0: i32) -> (i32, i32) {
    %c0_i32 = arith.constant 0 : i32
    %c0_i32_0 = arith.constant 0 : i32
    %c0_i32_1 = arith.constant 0 : i32
    return %c0_i32, %c0_i32_0 : i32, i32
  }
  func.func @transform_4(%arg0: i32) -> (i32, i32) {
    %c0_i32 = arith.constant 0 : i32
    %c0_i32_0 = arith.constant 0 : i32
    %c0_i32_1 = arith.constant 0 : i32
    return %c0_i32, %c0_i32_0 : i32, i32
  }
  func.func @transform_5(%arg0: i32) -> (i32, i32) {
    %c0_i32 = arith.constant 0 : i32
    %c0_i32_0 = arith.constant 0 : i32
    return %c0_i32, %arg0 : i32, i32
  }
}

</mosaic_0001>

<bundles_post_ra>
// kernel: tpu_custom_call.1
= control target key start
LH: loop header
LB: loop body
LE: loop exit
PB: predicated region body
PF: predicated region fallthrough
CT: control target
= control target key end

     0   :  { %s296_s0 = inlined_call_operand.vmem [shape: f32[2,128], index: 0, kind: input, shape index: {}]   ;;  %s297_s1 = inlined_call_operand.vmem [shape: f32[32,2], index: 1, kind: input, shape index: {}]   ;;  %s298_s2 = inlined_call_operand.vmem [shape: f32[32,1], index: 2, kind: input, shape index: {}]   ;;  %s299_s3 = inlined_call_operand.vmem [shape: f32[32,1], index: 3, kind: input, shape index: {}]   ;;  %s300_s4 = inlined_call_operand.<no memory space> [shape: f32[1,1], index: 4, kind: input, shape index: {}]   ;;  %s301_s5 = inlined_call_operand.hbm [shape: f32[1,128], index: 5, kind: output, shape index: {}]  }
   0x1   :  { %v10_v0 = vstv %s300_s4 }
   0x2   :  { %11 = vst [vmem:[#allocation2] sm:$0x1] %v10_v0 }
   0x3   :  { %v23_v1 = vld [vmem:[%s297_s1] sm:$0xff]  ;;  %v218_v2 = vmov 1   ;;  %v219_v3 = vmov 0   ;;  %v24_v4 = vld [vmem:[%s297_s1 + $0x8] sm:$0xff] }
   0x4   :  { %190 = vset.pattern.permute.xlu1 %v218_v2  ;;  %189 = vset.pattern.permute.xlu0 %v219_v3 }
   0x5   :  { %57 = vperm.xlu1 %190, %v23_v1   ;;  %38 = vperm.xlu0 %189, %v23_v1  }
   0x6   :  { %12 = vsyncpa [#allocation4], 0  ;;  %v25_v5 = vld [vmem:[%s297_s1 + $0x10] sm:$0xff]  ;;  %v26_v6 = vld [vmem:[%s297_s1 + $0x18] sm:$0xff]  ;;  %v113_v16 = vlaneseq }
   0x7   :  { %v31_v7 = vld [vmem:[%s298_s2] sm:$0xff]  ;;  %v32_v8 = vld [vmem:[%s298_s2 + $0x8] sm:$0xff]  ;;  %v33_v9 = vld [vmem:[%s298_s2 + $0x10] sm:$0xff] }
   0x8   :  { %v27_v10 = vld [vmem:[%s299_s3] sm:$0xff]  ;;  %v28_v11 = vld [vmem:[%s299_s3 + $0x8] sm:$0xff]  ;;  %v34_v12 = vld [vmem:[%s298_s2 + $0x18] sm:$0xff]  ;;  %v114_v19 = vshrl.u32 %v113_v16, 7 }
   0x9   :  { %61 = vperm.xlu1 %190, %v24_v4   ;;  %43 = vperm.xlu0 %189, %v24_v4   ;;  %v29_v13 = vld [vmem:[%s299_s3 + $0x10] sm:$0xff]  ;;  %v30_v14 = vld [vmem:[%s299_s3 + $0x18] sm:$0xff]  ;;  %v35_v15 = vld [vmem:[#allocation2] sm:$0x1] }
   0xa   :  { %v123_v22 = vsub.s32 1, %v114_v19  ;;  %v115_v23 = vsub.s32 0, %v114_v19  ;;  %v112_v24 = vld [vmem:[%s296_s0] sm:$0x3]  ;;  %s220_s0 = smov [#allocation3]  }
   0xb   :  { %s177_s3 = sshll.u32 %s220_s0, 4  ;;  %s178_s3 = int_to_ptr.vmem [resolvable:$true] %s177_s3 }
   0xc   :  { %v124_v27 = vrot.slane %v112_v24, %v123_v22  ;;  %v116_v28 = vrot.slane %v112_v24, %v115_v23  ;;  %s196_s18 = scalar_lea.vmem %s178_s3, 16  ;;  %s200_s19 = scalar_lea.vmem %s178_s3, 32 }
   0xd   :  { %65 = vperm.xlu1 %190, %v25_v5   ;;  %48 = vperm.xlu0 %189, %v25_v5   ;;  %p197_p0 = scmp.ne.s32.totalorder %s178_s3, %s196_s18  ;;  %p201_p1 = scmp.lt.s32.totalorder %s178_s3, %s178_s3 }
   0xe   :  { %p202_p2 = scmp.lt.s32.totalorder %s200_s19, %s196_s18 }
  0x10   :  { %p203_p3 = por %p202_p2, %p201_p1 }
  0x11   :  { %69 = vperm.xlu1 %190, %v26_v6   ;;  %53 = vperm.xlu0 %189, %v26_v6  }
  0x12   :  { %p204_p4 = pnand %p203_p3, %p197_p0 }
  0x15   :  { %191 = vset.pattern.permute.xlu1 %v219_v3  ;;  %94 = vperm.xlu0 %189, %v31_v7  }
  0x16   :  { %99 = vperm.xlu1 %191, %v32_v8  }
  0x19   :  { %104 = vperm.xlu0 %189, %v33_v9  }
  0x1a   :  { %74 = vperm.xlu1 %191, %v27_v10  }
  0x1d   :  { %79 = vperm.xlu0 %189, %v28_v11  }
  0x1e   :  { %109 = vperm.xlu1 %191, %v34_v12  }
  0x21   :  { %84 = vperm.xlu0 %189, %v29_v13  }
  0x22   :  { %89 = vperm.xlu1 %191, %v30_v14  }
  0x25   :  { %156 = vperm.xlu0 %189, %v35_v15  }
  0x80   :  { %v58_v17 = vpop.permute.xlu1 %57  ;;  %v39_v18 = vpop.permute.xlu0 %38 }
  0x81   :  { %v125_v31 = vmul.f32 %v124_v27, %v58_v17  ;;  %v117_v32 = vmul.f32 %v116_v28, %v39_v18 }
  0x83   :  { %v129_v38 = vadd.f32 %v125_v31, %v117_v32 }
  0x84   :  { %v62_v20 = vpop.permute.xlu1 %61  ;;  %v44_v21 = vpop.permute.xlu0 %43 }
  0x85   :  { %v126_v33 = vmul.f32 %v124_v27, %v62_v20  ;;  %v118_v34 = vmul.f32 %v116_v28, %v44_v21 }
  0x87   :  { %v130_v40 = vadd.f32 %v126_v33, %v118_v34 }
  0x88   :  { %v66_v25 = vpop.permute.xlu1 %65  ;;  %v49_v26 = vpop.permute.xlu0 %48 }
  0x89   :  { %v127_v36 = vmul.f32 %v124_v27, %v66_v25  ;;  %v119_v37 = vmul.f32 %v116_v28, %v49_v26 }
  0x8b   :  { %v131_v46 = vadd.f32 %v127_v36, %v119_v37 }
  0x8c   :  { %v70_v29 = vpop.permute.xlu1 %69  ;;  %v54_v30 = vpop.permute.xlu0 %53 }
  0x8d   :  { %v128_v43 = vmul.f32 %v124_v27, %v70_v29  ;;  %v120_v44 = vmul.f32 %v116_v28, %v54_v30 }
  0x8f   :  { %v132_v52 = vadd.f32 %v128_v43, %v120_v44 }
  0x90   :  { %v95_v35 = vpop.permute.xlu0 %94 }
  0x91   :  { %v100_v39 = vpop.permute.xlu1 %99  ;;  %v133_v41 = vadd.f32 %v129_v38, %v95_v35 }
  0x92   :  { %v134_v42 = vadd.f32 %v130_v40, %v100_v39 }
  0x93   :  { %v137_v48 = vmax.f32 %v133_v41, 0.0 }
  0x94   :  { %v105_v45 = vpop.permute.xlu0 %104  ;;  %v138_v49 = vmax.f32 %v134_v42, 0.0 }
  0x95   :  { %v75_v47 = vpop.permute.xlu1 %74  ;;  %v135_v50 = vadd.f32 %v131_v46, %v105_v45 }
  0x96   :  { %v141_v57 = vmul.f32 %v137_v48, %v75_v47 }
  0x97   :  { %v139_v56 = vmax.f32 %v135_v50, 0.0 }
  0x98   :  { %v80_v51 = vpop.permute.xlu0 %79 }
  0x99   :  { %v142_v53 = vmul.f32 %v138_v49, %v80_v51  ;;  %v110_v54 = vpop.permute.xlu1 %109 }
  0x9a   :  { %v136_v55 = vadd.f32 %v132_v52, %v110_v54 }
  0x9b   :  { %v145_v60 = vadd.f32 %v142_v53, %v141_v57 }
  0x9c   :  { %v140_v58 = vmax.f32 %v136_v55, 0.0  ;;  %v85_v59 = vpop.permute.xlu0 %84 }
  0x9d   :  { %v143_v61 = vmul.f32 %v139_v56, %v85_v59  ;;  %v90_v62 = vpop.permute.xlu1 %89 }
  0x9e   :  { %v144_v63 = vmul.f32 %v140_v58, %v90_v62 }
  0x9f   :  { %v146_v0 = vadd.f32 %v145_v60, %v143_v61 }
  0xa0   :  { %v157_v6 = vpop.permute.xlu0 %156 }
  0xa1   :  { %v147_v1 = vadd.f32 %v146_v0, %v144_v63  ;;  %v162_v9 = vrot.slane %v157_v6, %v115_v23 }
  0xa3   :  { %v148_v2 = vrot.slane %v147_v1, 4 }
  0xa5   :  { %v149_v3 = vadd.f32 %v148_v2, %v147_v1 }
  0xa7   :  { %v150_v4 = vrot.slane %v149_v3, 2 }
  0xa9   :  { %v151_v5 = vadd.f32 %v150_v4, %v149_v3 }
  0xab   :  { %v152_v7 = vrot.slane %v151_v5, 1 }
  0xad   :  { %v153_v8 = vadd.f32 %v152_v7, %v151_v5 }
  0xaf   :  { %v163_v10 = vadd.f32 %v162_v9, %v153_v8 }
  0xb1   :  { %v185_v11 = vmul.f32 -1.442695, %v163_v10 }
  0xb3   :  { %192 = vpow2.f32 %v185_v11 }
  0xc0   :  { %v193_v12 = vpop.eup %192 }
  0xc1   :  { %v167_v13 = vadd.f32 1.0, %v193_v12 }
  0xc3   :  { %194 = vrcp.f32 %v167_v13 }
  0xd0   :  { %v195_v14 = vpop.eup %194 }
  0xd1   :  { %170 = vst [vmem:[#allocation3] sm:$0x1] %v195_v14 }
  0xd2   :  { %207 = shalt.err (!%p204_p4)
}
  0xd3   :  { %180 = dma.vmem_to_hbm [thread:$0]  %s178_s3, 16, %s301_s5, [#allocation4]  }
  0xd4   :  { %216 = dma.done.wait [#allocation4], 16  }
  0xd5   :  { %217 = vsyncadd [#allocation4], 4294967280 }
  0xd6   :  { %184 = vsyncpa [#allocation4], 1 }

</bundles_post_ra>
